<compile_context>
chip_gen: v7x
topology: tpu7x:2x2x1
jax: 0.10.0
libtpu: 0.0.40
codegen_flags: <defaults>
</compile_context>

<pallas_src>
import functools

import jax
import jax.numpy as jnp
from jax.experimental import pallas as pl
from jax.experimental.pallas import tpu as pltpu


def _round_up(x, m):
    return ((x + m - 1) // m) * m


def _sublane_multiple(dtype):
    """Minimum second-to-last tile dim: f32 -> 8, bf16 -> 16, int8/fp8 -> 32."""
    return {4: 8, 2: 16, 1: 32}.get(jnp.dtype(dtype).itemsize, 8)


def _vmem_budget_bytes():
    """Generation-aware usable-VMEM budget, leaving headroom for compiler scratch."""
    try:
        cap = pltpu.get_tpu_info().vmem_capacity_bytes
    except Exception:
        cap = 64 << 20  # conservative (v7x per-TC size) if the query is unavailable
    # ~78% of physical: ~50 MiB on v7x (64 MiB VMEM), ~100 MiB on v5e/v6e (128 MiB).
    return max(int(cap * 0.78), 16 << 20)


def _weight_slab_bytes(H, ti, dsize):
    """Per-k-step weight footprint: (H, 2*ti) gate|up + (ti, H) down, double-buffered."""
    return 2 * (H * 2 * ti + ti * H + 2 * ti) * dsize + 2 * H * dsize


def _pick_tile_i(I, H, dsize, budget):
    """Largest lane-aligned intermediate tile whose weight slabs fit the budget."""
    for cand in (512, 256, 128):
        if I % cand == 0 and _weight_slab_bytes(H, cand, dsize) <= budget // 2:
            return cand
    if I % 128 == 0:
        return 128
    if _weight_slab_bytes(H, I, dsize) <= budget // 2:
        return I  # tiny / awkward I: stage the whole intermediate dim
    raise ValueError(
        f"intermediate_size={I} is not a multiple of 128 and too large to stage "
        f"as a single slab; pad intermediate_size to a multiple of 128.")


def _maybe_buffered_spec(block_shape, index_map, buffer_count):
    """BlockSpec with pipeline_mode=Buffered(n) when available (VMEM saver)."""
    if buffer_count is not None and hasattr(pl, "Buffered"):
        try:
            return pl.BlockSpec(block_shape, index_map,
                                pipeline_mode=pl.Buffered(buffer_count))
        except TypeError:
            pass
    return pl.BlockSpec(block_shape, index_map)


def pack_llama_mlp_params(wg, bg, wu, bu, wd, bd, *, ti=None):
    """Pre-pack gate|up weights/biases ONCE at weight-load time.

    This is intentionally OUTSIDE the jitted forward: the (H, 2I) concat is a
    full extra weight read+write in HBM and must not run per forward call.
    Block k of the packed matrix along the last axis is [gate_tile_k | up_tile_k]
    so the kernel does one fused MXU matmul per intermediate tile.
    """
    H, I = wg.shape
    dsize = jnp.dtype(wg.dtype).itemsize
    if ti is None:
        ti = _pick_tile_i(I, H, dsize, _vmem_budget_bytes())
    assert I % ti == 0, "intermediate tile must divide intermediate_size"
    nk = I // ti
    wgu = jnp.concatenate(
        [wg.reshape(H, nk, ti), wu.reshape(H, nk, ti)], axis=-1).reshape(H, 2 * I)
    bgu = jnp.concatenate(
        [bg.reshape(nk, ti), bu.reshape(nk, ti)], axis=-1).reshape(1, 2 * I)
    bd2 = bd.reshape(1, H)
    return (wgu, bgu, wd, bd2), ti


def llama_mlp_kernel(x_ref, wgu_ref, bgu_ref, wd_ref, bd_ref, o_ref, acc_ref,
                     *, ti):
    """One (row-tile i, intermediate-tile k) step of the fused Llama MLP.

    x_ref  : (tm, H)       row tile of flattened tokens (k-invariant)
    wgu_ref: (H, 2*ti)     [gate | up] weight slab for intermediate tile k
    bgu_ref: (1, 2*ti)     [gate | up] bias slab for intermediate tile k
    wd_ref : (ti, H)       down_proj weight slab for intermediate tile k
    bd_ref : (1, H)        down_proj bias (added exactly once, at last k)
    o_ref  : (tm, H)       output tile (written once, at last k)
    acc_ref: (tm, H) f32   VMEM accumulator for the down projection
    """
    k = pl.program_id(1)

    @pl.when(k == 0)
    def _():
        acc_ref[...] = jnp.zeros_like(acc_ref)

    x = x_ref[...]

    # Fused gate|up projection: a single MXU matmul with doubled N, f32 accum.
    gu = jnp.dot(x, wgu_ref[...], preferred_element_type=jnp.float32)
    gu = gu + bgu_ref[...].astype(jnp.float32)
    g = gu[:, :ti]
    u = gu[:, ti:]

    # SiLU(gate) * up in f32 (VPU + EUP), then cast for the down-proj MXU op.
    h = (g * jax.nn.sigmoid(g)) * u

    # TODO(synk): on v7x an MRB in-place accumulate (matmul_push/acc/pop) could
    # replace this VMEM read-modify-write if a bundle dump shows vld/vst pressure.
    acc_ref[...] += jnp.dot(h.astype(wd_ref.dtype), wd_ref[...],
                            preferred_element_type=jnp.float32)

    @pl.when(k == pl.num_programs(1) - 1)
    def _():
        o_ref[...] = (acc_ref[...]
                      + bd_ref[...].astype(jnp.float32)).astype(o_ref.dtype)


@functools.partial(jax.jit, static_argnames=("ti", "tm"))
def llama_mlp(x, packed_params, *, ti, tm=None):
    """x: (batch, seq, H). packed_params from pack_llama_mlp_params()."""
    wgu, bgu, wd, bd2 = packed_params
    batch, seq, H = x.shape
    I = wd.shape[0]
    assert I % ti == 0
    nk = I // ti
    M = batch * seq

    dsize = jnp.dtype(x.dtype).itemsize
    sub = _sublane_multiple(x.dtype)
    budget = _vmem_budget_bytes()

    # --- tile selection ------------------------------------------------------
    slab = _weight_slab_bytes(H, ti, dsize)          # weight slabs per k-step
    per_row = H * (3 * dsize + 4)                    # x (1x) + out (2x) + f32 acc

    if tm is None:
        # Prefill target tm=512 amortizes the ceil(M/tm) weight re-streams well
        # past the bf16 MXU roofline; bounded by row count and by the VMEM budget.
        tm_rows = _round_up(min(M, 512), sub)
        tm_vmem = max((((budget - slab) // per_row) // sub) * sub, sub)
        tm = max(min(tm_rows, tm_vmem), sub)

    M_pad = _round_up(M, tm)
    # Megacore: keep the "parallel" row axis >= 2 programs whenever rows allow,
    # so both TensorCores on a v7x chip stay busy for decode-sized batches.
    if M_pad // tm < 2 and M > sub:
        tm = _round_up(-(-M // 2), sub)
        M_pad = _round_up(M, tm)

    # --- operand staging -----------------------------------------------------
    x2d = x.reshape(M, H)
    if M_pad != M:
        x2d = jnp.pad(x2d, ((0, M_pad - M), (0, 0)))

    # --- VMEM limit & cost hint ----------------------------------------------
    need = slab + tm * per_row + (1 << 20)
    vmem_limit = int(min(max(2 * need, 16 << 20), max(budget, need)))

    n_row_tiles = M_pad // tm
    cost = pl.CostEstimate(
        flops=6 * M_pad * H * I,                     # 2*M*H*(2I) + 2*M*I*H
        transcendentals=M_pad * I,                   # sigmoid
        bytes_accessed=(2 * M_pad * H * dsize        # x in + out
                        + n_row_tiles * 3 * H * I * dsize   # weights re-streamed per row tile
                        + (2 * I + H) * dsize),      # biases
    )

    out2d = pl.pallas_call(
        functools.partial(llama_mlp_kernel, ti=ti),
        out_shape=jax.ShapeDtypeStruct((M_pad, H), x.dtype),
        grid_spec=pltpu.PrefetchScalarGridSpec(
            num_scalar_prefetch=0,
            grid=(n_row_tiles, nk),                   # reduction axis last
            in_specs=[
                # x tile is k-invariant: single buffer reclaims tm*H*dsize of VMEM.
                _maybe_buffered_spec((tm, H), lambda i, k: (i, 0), 1),
                pl.BlockSpec((H, 2 * ti), lambda i, k: (0, k)),    # gate|up W slab
                pl.BlockSpec((1, 2 * ti), lambda i, k: (0, k)),    # gate|up bias slab
                pl.BlockSpec((ti, H), lambda i, k: (k, 0)),        # down W slab
                pl.BlockSpec((1, H), lambda i, k: (0, 0)),         # down bias
            ],
            out_specs=pl.BlockSpec((tm, H), lambda i, k: (i, 0)),
            scratch_shapes=[pltpu.VMEM((tm, H), jnp.float32)],
        ),
        compiler_params=pltpu.CompilerParams(
            dimension_semantics=("parallel", "arbitrary"),
            vmem_limit_bytes=vmem_limit,
        ),
        cost_estimate=cost,
    )(x2d, wgu, bgu, wd, bd2)

    return out2d[:M].reshape(batch, seq, H)


def init_params(key, hidden_size):
    """Deterministic synthetic params mimicking nn.Linear shapes.

    PyTorch stores weights as (out, in); we store the transpose (in, out).
    Uniform(-1/sqrt(fan_in), 1/sqrt(fan_in)) like nn.Linear's default init.
    """
    inter = hidden_size * 2
    k = jax.random.split(key, 6)

    def uinit(k, shape, fan_in):
        bound = 1.0 / (fan_in ** 0.5)
        return jax.random.uniform(k, shape, jnp.float32, -bound, bound)

    wg = uinit(k[0], (hidden_size, inter), hidden_size)
    bg = uinit(k[1], (inter,), hidden_size)
    wu = uinit(k[2], (hidden_size, inter), hidden_size)
    bu = uinit(k[3], (inter,), hidden_size)
    wd = uinit(k[4], (inter, hidden_size), inter)
    bd = uinit(k[5], (hidden_size,), inter)
    return wg, bg, wu, bu, wd, bd


def reference_mlp(x, wg, bg, wu, bu, wd, bd):
    g = x @ wg + bg
    u = x @ wu + bu
    h = (g * jax.nn.sigmoid(g)) * u
    return h @ wd + bd


if __name__ == "__main__":
    batch, seq, hidden = 2, 8, 32

    key = jax.random.PRNGKey(0)
    kx, kp = jax.random.split(key)
    x = jax.random.normal(kx, (batch, seq, hidden), jnp.float32)
    raw_params = init_params(kp, hidden)

    # Weight packing happens ONCE here (weight-load time), not per forward.
    packed_params, ti = pack_llama_mlp_params(*raw_params)

    out = llama_mlp(x, packed_params, ti=ti)
    out = jax.block_until_ready(out)

    ref = reference_mlp(x, *raw_params)
    assert out.shape == (batch, seq, hidden)
    assert jnp.allclose(out, ref, atol=1e-4, rtol=1e-4), "mismatch vs reference"

    print("KERNEL_OK")
</pallas_src>

<mosaic_0001>
module attributes {stable_mosaic.version = 11 : i64} {
  func.func @llama_mlp_kernel(%arg0: i32, %arg1: i32, %arg2: memref<8x32xf32, #tpu.memory_space<vmem>>, %arg3: memref<32x128xf32, #tpu.memory_space<vmem>>, %arg4: memref<1x128xf32, #tpu.memory_space<vmem>>, %arg5: memref<64x32xf32, #tpu.memory_space<vmem>>, %arg6: memref<1x32xf32, #tpu.memory_space<vmem>>, %arg7: memref<8x32xf32, #tpu.memory_space<vmem>>, %arg8: memref<8x32xf32, #tpu.memory_space<vmem>>) attributes {dimension_semantics = [#tpu.dimension_semantics<parallel>, #tpu.dimension_semantics<arbitrary>], iteration_bounds = array<i64: 2, 1>, scalar_prefetch = 0 : i64, scratch_operands = 1 : i64, tpu.core_type = #tpu.core_type<tc>, window_params = [{pipeline_mode = #tpu.pipeline_mode<synchronous>, transform_indices = @transform_0, window_bounds = array<i64: 8, 32>}, {transform_indices = @transform_1, window_bounds = array<i64: 32, 128>}, {transform_indices = @transform_2, window_bounds = array<i64: 1, 128>}, {transform_indices = @transform_3, window_bounds = array<i64: 64, 32>}, {pipeline_mode = #tpu.pipeline_mode<synchronous>, transform_indices = @transform_4, window_bounds = array<i64: 1, 32>}, {transform_indices = @transform_5, window_bounds = array<i64: 8, 32>}]} {
    %c0_i32 = arith.constant 0 : i32
    %0 = arith.cmpi eq, %arg1, %c0_i32 : i32
    %1 = arith.extui %0 : i1 to i32
    %c0_i32_0 = arith.constant 0 : i32
    %2 = arith.cmpi ne, %1, %c0_i32_0 : i32
    scf.if %2 {
      %cst_16 = arith.constant 0.000000e+00 : f32
      %26 = vector.broadcast %cst_16 : f32 to vector<8x32xf32>
      %c0_17 = arith.constant 0 : index
      %c0_18 = arith.constant 0 : index
      %27 = vector.load %arg8[%c0_17, %c0_18] : memref<8x32xf32, #tpu.memory_space<vmem>>, vector<8x32xf32>
      tpu.vector_store %arg8[%c0_17, %c0_18], %26 {strides = array<i32>} : memref<8x32xf32, #tpu.memory_space<vmem>>, vector<8x32xf32>,
    } else {
    }
    %c0 = arith.constant 0 : index
    %c0_1 = arith.constant 0 : index
    %3 = vector.load %arg2[%c0, %c0_1] : memref<8x32xf32, #tpu.memory_space<vmem>>, vector<8x32xf32>
    %c0_2 = arith.constant 0 : index
    %c0_3 = arith.constant 0 : index
    %4 = vector.load %arg3[%c0_2, %c0_3] : memref<32x128xf32, #tpu.memory_space<vmem>>, vector<32x128xf32>
    %cst = arith.constant dense<0.000000e+00> : vector<8x128xf32>
    %5 = tpu.matmul %3, %4, %cst {dimension_numbers = #tpu.dot_dimension_numbers<[1], [0], [0], [1], [0, 0, 1, 1], [], []>} : vector<8x32xf32>, vector<32x128xf32>, vector<8x128xf32> -> vector<8x128xf32>
    %c0_4 = arith.constant 0 : index
    %c0_5 = arith.constant 0 : index
    %6 = vector.load %arg4[%c0_4, %c0_5] : memref<1x128xf32, #tpu.memory_space<vmem>>, vector<1x128xf32>
    %7 = vector.broadcast %6 : vector<1x128xf32> to vector<8x128xf32>
    %8 = arith.addf %5, %7 : vector<8x128xf32>
    %9 = vector.extract_strided_slice %8 {offsets = [0, 0], sizes = [8, 64], strides = [1, 1]} : vector<8x128xf32> to vector<8x64xf32>
    %10 = vector.extract_strided_slice %8 {offsets = [0, 64], sizes = [8, 64], strides = [1, 1]} : vector<8x128xf32> to vector<8x64xf32>
    %11 = arith.negf %9 : vector<8x64xf32>
    %12 = math.exp %11 : vector<8x64xf32>
    %cst_6 = arith.constant 1.000000e+00 : f32
    %13 = vector.broadcast %cst_6 : f32 to vector<8x64xf32>
    %14 = arith.addf %13, %12 : vector<8x64xf32>
    %15 = arith.divf %13, %14 : vector<8x64xf32>
    %16 = arith.mulf %9, %15 : vector<8x64xf32>
    %17 = arith.mulf %16, %10 : vector<8x64xf32>
    %c0_7 = arith.constant 0 : index
    %c0_8 = arith.constant 0 : index
    %18 = vector.load %arg8[%c0_7, %c0_8] : memref<8x32xf32, #tpu.memory_space<vmem>>, vector<8x32xf32>
    %c0_9 = arith.constant 0 : index
    %c0_10 = arith.constant 0 : index
    %19 = vector.load %arg5[%c0_9, %c0_10] : memref<64x32xf32, #tpu.memory_space<vmem>>, vector<64x32xf32>
    %cst_11 = arith.constant dense<0.000000e+00> : vector<8x32xf32>
    %20 = tpu.matmul %17, %19, %cst_11 {dimension_numbers = #tpu.dot_dimension_numbers<[1], [0], [0], [1], [0, 0, 1, 1], [], []>} : vector<8x64xf32>, vector<64x32xf32>, vector<8x32xf32> -> vector<8x32xf32>
    %21 = arith.addf %18, %20 : vector<8x32xf32>
    %c0_12 = arith.constant 0 : index
    %c0_13 = arith.constant 0 : index
    %22 = vector.load %arg8[%c0_12, %c0_13] : memref<8x32xf32, #tpu.memory_space<vmem>>, vector<8x32xf32>
    tpu.vector_store %arg8[%c0_12, %c0_13], %21 {strides = array<i32>} : memref<8x32xf32, #tpu.memory_space<vmem>>, vector<8x32xf32>,
    %c0_i32_14 = arith.constant 0 : i32
    %23 = arith.cmpi eq, %arg1, %c0_i32_14 : i32
    %24 = arith.extui %23 : i1 to i32
    %c0_i32_15 = arith.constant 0 : i32
    %25 = arith.cmpi ne, %24, %c0_i32_15 : i32
    scf.if %25 {
      %c0_16 = arith.constant 0 : index
      %c0_17 = arith.constant 0 : index
      %26 = vector.load %arg8[%c0_16, %c0_17] : memref<8x32xf32, #tpu.memory_space<vmem>>, vector<8x32xf32>
      %c0_18 = arith.constant 0 : index
      %c0_19 = arith.constant 0 : index
      %27 = vector.load %arg6[%c0_18, %c0_19] : memref<1x32xf32, #tpu.memory_space<vmem>>, vector<1x32xf32>
      %28 = vector.broadcast %27 : vector<1x32xf32> to vector<8x32xf32>
      %29 = arith.addf %26, %28 : vector<8x32xf32>
      %c0_20 = arith.constant 0 : index
      %c0_21 = arith.constant 0 : index
      %30 = vector.load %arg7[%c0_20, %c0_21] : memref<8x32xf32, #tpu.memory_space<vmem>>, vector<8x32xf32>
      tpu.vector_store %arg7[%c0_20, %c0_21], %29 {strides = array<i32>} : memref<8x32xf32, #tpu.memory_space<vmem>>, vector<8x32xf32>,
    } else {
    }
    return
  }
  func.func @transform_0(%arg0: i32, %arg1: i32) -> (i32, i32) {
    %c0_i32 = arith.constant 0 : i32
    %c0_i32_0 = arith.constant 0 : i32
    return %arg0, %c0_i32 : i32, i32
  }
  func.func @transform_1(%arg0: i32, %arg1: i32) -> (i32, i32) {
    %c0_i32 = arith.constant 0 : i32
    %c0_i32_0 = arith.constant 0 : i32
    return %c0_i32, %arg1 : i32, i32
  }
  func.func @transform_2(%arg0: i32, %arg1: i32) -> (i32, i32) {
    %c0_i32 = arith.constant 0 : i32
    %c0_i32_0 = arith.constant 0 : i32
    return %c0_i32, %arg1 : i32, i32
  }
  func.func @transform_3(%arg0: i32, %arg1: i32) -> (i32, i32) {
    %c0_i32 = arith.constant 0 : i32
    %c0_i32_0 = arith.constant 0 : i32
    return %arg1, %c0_i32 : i32, i32
  }
  func.func @transform_4(%arg0: i32, %arg1: i32) -> (i32, i32) {
    %c0_i32 = arith.constant 0 : i32
    %c0_i32_0 = arith.constant 0 : i32
    %c0_i32_1 = arith.constant 0 : i32
    return %c0_i32, %c0_i32_0 : i32, i32
  }
  func.func @transform_5(%arg0: i32, %arg1: i32) -> (i32, i32) {
    %c0_i32 = arith.constant 0 : i32
    %c0_i32_0 = arith.constant 0 : i32
    return %arg0, %c0_i32 : i32, i32
  }
}

</mosaic_0001>

<bundles_post_ra>
// kernel: llama_mlp.1
= control target key start
LH: loop header
LB: loop body
LE: loop exit
PB: predicated region body
PF: predicated region fallthrough
CT: control target
= control target key end

     0   :  { %10 = vsyncpa [#allocation4], 0  ;;  %s1029_s0 = inlined_call_operand.vmem [shape: f32[16,32], index: 0, kind: input, shape index: {}]   ;;  %s1030_s1 = inlined_call_operand.vmem [shape: f32[32,128], index: 1, kind: input, shape index: {}]   ;;  %s1031_s2 = inlined_call_operand.vmem [shape: f32[1,128], index: 2, kind: input, shape index: {}]   ;;  %s1032_s3 = inlined_call_operand.vmem [shape: f32[64,32], index: 3, kind: input, shape index: {}]   ;;  %s1033_s4 = inlined_call_operand.vmem [shape: f32[1,32], index: 4, kind: input, shape index: {}]   ;;  %s1034_s5 = inlined_call_operand.hbm [shape: f32[16,32], index: 5, kind: output, shape index: {}]  }
   0x1   :  { %12 = vsyncpa [#allocation4 + $0x1], 0  ;;  %s871_s18 = smov 0   ;;  %s873_s19 = smov 0  }
   0x2   :  { %s875_s20 = smov 0   ;;  %s877_s21 = smov 0  }
   0x3   :  { %s879_s22 = smov 0   ;;  %s881_s23 = smov 0  }
   0x4 LB: > { %s613_s24 = sadd.s32 4294967295, %s834_s23   ;;  %s614_s25 = sadd.s32 4294967294, %s834_s23   ;;  %s834_s23 = sphi %s881_s23, %s18_s23   ;;  %s830_s22 = sphi %s879_s22, %s1041_s22   ;;  %s826_s21 = sphi %s877_s21, %s1040_s21   ;;  %s822_s20 = sphi %s875_s20, %s1039_s20   ;;  %s818_s19 = sphi %s873_s19, %s1038_s19   ;;  %s814_s18 = sphi %s871_s18, %s1037_s18  }
   0x5   : > { %s30_s26 = sadd.s32 1, %s830_s22  ;;  %s162_s27 = sadd.s32 1, %s822_s20 }
   0x6   : > { %p32_p0 = scmp.ge.s32.totalorder %s30_s26, 2  ;;  %p172_p1 = scmp.ne.s32.totalorder %s822_s20, %s818_s19 }
   0x7   : > { %p173_p2 = scmp.eq.s32.totalorder %s613_s24, 1  ;;  %p178_p3 = scmp.ne.s32.totalorder %s818_s19, %s814_s18 }
   0x8   : > { %s1043_s26 = smov (%p32_p0, %s30_s26), 0  ;;  %p179_p5 = scmp.eq.s32.totalorder %s614_s25, 1 }
   0x9   : > { %p911_p4 = por %p173_p2, %p172_p1  ;;  %s159_s29 = ssub.s32 %s830_s22, %s1043_s26 }
   0xa   : > { %p619_p6 = scmp.ge.s32.totalorder %s834_s23, 1  ;;  %p160_p7 = scmp.eq.s32.totalorder %s159_s29, 0 }
   0xb   : > { %p918_p8 = por %p179_p5, %p178_p3  ;;  %p229_p9 = scmp.lt.s32.totalorder %s834_s23, 3 }
   0xc   : > { %s924_s6 = scalar_select %p160_p7, %s822_s20, %s162_s27  }
   0xd   : > { %p230_p10 = pnand %p619_p6, %p229_p9 }
   0xe   : > { %v292_v0 = vld [vmem:[%s1030_s1] sm:$0xff] (!%p230_p10)  ;;  %v293_v1 = vld [vmem:[%s1030_s1 + $0x8] sm:$0xff] (!%p230_p10)  ;;  %v294_v2 = vld [vmem:[%s1030_s1 + $0x10] sm:$0xff] (!%p230_p10)  ;;  %v836_v3 = vmov (!%p230_p10), 0.0|0.0   ;;  %vm837_vm0 = vmmov (!%p230_p10), 0   ;;  %v838_v6 = vmov (!%p230_p10), 0.0  }
   0xf   : > { %233 = sbr.rel (%p230_p10) target bundleno = 596 (0x254), region = 40  ;;  %675 = vmatprep.subr.bf16.mxu0 (!%p230_p10), %v836_v3  ;;  %v676_v4 = vpack.c.bf16 (!%p230_p10), %v293_v1, %v292_v0  ;;  %v295_v5 = vld [vmem:[%s1030_s1 + $0x18] sm:$0xff] (!%p230_p10)  ;;  %653 = vmatprep.mubr.msk.f32.mxu0 (!%p230_p10), %vm837_vm0, %v838_v6  ;;  %p268_p11 = scmp.lt.s32.totalorder (!%p230_p10), %s826_s21, 1  ;;  %vm289_vm1 = vcmask (!%p230_p10), 261120   ;;  %v390_v9 = vld [vmem:[%s1032_s3] sm:$0xff] (!%p230_p10)  ;;  %v391_v10 = vld [vmem:[%s1032_s3 + $0x8] sm:$0xff] (!%p230_p10) }
  0x10   : > { %290 = vst.msk [vmem:[#allocation2] sm:$0xff] (!%p230_p10), %vm289_vm1, %v838_v6  ;;  %681 = vmatprep.subr.bf16.mxu1 (!%p230_p10), %v836_v3  ;;  %672 = vmatprep.mubr.msk.f32.mxu1 (!%p230_p10), %vm837_vm0, %v838_v6  ;;  %v679_v7 = vpack.c.bf16 (!%p230_p10), %v295_v5, %v294_v2  ;;  %v392_v11 = vld [vmem:[%s1032_s3 + $0x10] sm:$0xff] (!%p230_p10)  ;;  %v682_v12 = vpack.c.bf16 (!%p230_p10), %v391_v10, %v390_v9  ;;  %v393_v13 = vld [vmem:[%s1032_s3 + $0x18] sm:$0xff] (!%p230_p10)  ;;  %v394_v15 = vld [vmem:[%s1032_s3 + $0x20] sm:$0xff] (!%p230_p10)  ;;  %s839_s8 = smov (!%p230_p10), 64   ;;  %vm398_vm2 = vcmask (!%p230_p10), 523264  }
  0x11   : > { %677 = vmatpush3.bf16.msra.mxu0 (!%p230_p10), %v676_v4  ;;  %v685_v14 = vpack.c.bf16 (!%p230_p10), %v393_v13, %v392_v11  ;;  %v395_v16 = vld [vmem:[%s1032_s3 + $0x28] sm:$0xff] (!%p230_p10)  ;;  %v396_v18 = vld [vmem:[%s1032_s3 + $0x30] sm:$0xff] (!%p230_p10)  ;;  %v397_v19 = vld [vmem:[%s1032_s3 + $0x38] sm:$0xff] (!%p230_p10)  ;;  %s265_s9 = sand.u32 (!%p230_p10), 1, %s818_s19   ;;  %s628_s13 = sshll.u32 (!%p230_p10), %s826_s21, 7 }
  0x12   : > { %678 = vmatprep.subr.bf16.mxu0 (!%p230_p10), %v836_v3  ;;  %683 = vmatpush3.bf16.msra.mxu1 (!%p230_p10), %v682_v12  ;;  %v688_v17 = vpack.c.bf16 (!%p230_p10), %v395_v16, %v394_v15  ;;  %v691_v20 = vpack.c.bf16 (!%p230_p10), %v397_v19, %v396_v18  ;;  %v622_v21 = vld [vmem:[%s1031_s2] ss:$0 sm:$0xff] (!%p230_p10)  ;;  %s620_s10 = sshll.u32 (!%p230_p10), %s265_s9, 3  ;;  %s981_s24 = scalar_lea.hbm (!%p230_p10), %s1034_s5, %s628_s13 }
  0x13   : > { %684 = vmatprep.subr.bf16.mxu1 (!%p230_p10), %v836_v3  ;;  %v626_v36 = vld [vmem:[%s1033_s4] ss:$0 sm:$0xff] (!%p230_p10)  ;;  %s267_s14 = scalar_lea.vmem (!%p230_p10), [#allocation3], %s620_s10 }
  0x15   : > { %680 = vmatpush3.bf16.msra.mxu0 (!%p230_p10), %v679_v7 }
  0x16   : > { %s269_s15 = scalar_select %p268_p11, %s826_s21, 1  ;;  %686 = vmatpush3.bf16.msra.mxu1 %v685_v14 }
  0x17   : > { %687 = vmatprep.subr.bf16.mxu1 %v836_v3  ;;  %v389_v32 = vld [vmem:[#allocation2] sm:$0xff]  ;;  %s840_s21 = smov [#allocation3]  }
  0x18   : > { %s621_s16 = sshll.u32 %s269_s15, 3  ;;  %s501_s15 = sshll.u32 %s267_s14, 4  ;;  %s983_s15 = int_to_ptr.vmem [resolvable:$true] %s501_s15 }
  0x19   : > { %s271_s25 = scalar_lea.vmem %s1029_s0, %s621_s16  ;;  %s756_s27 = scalar_lea.vmem %s983_s15, 128 }
  0x1a   : > { %v291_v8 = vld [vmem:[%s271_s25] sm:$0xff]  ;;  %689 = vmatpush3.bf16.msra.mxu1 %v688_v17  ;;  %s488_s25 = scalar_lea.sflag [#allocation4], %s265_s9  ;;  %p757_p12 = scmp.ne.s32.totalorder %s983_s15, %s756_s27 }
  0x1b   : > { %654 = vmatmul.mubr.msk.f32.vlgmr.msra.gmra.mrb[0].mxu0 %vm289_vm1, %v291_v8  ;;  %690 = vmatprep.subr.bf16.mxu1 %v836_v3  ;;  %s760_s29 = sshll.u32 %s840_s21, 4  ;;  %s761_s29 = int_to_ptr.vmem [resolvable:$false] %s760_s29 }
  0x1c   : > { %p758_p13 = pnand %p757_p12, %p911_p4  ;;  %s762_s7 = scalar_lea.vmem %s761_s29, 256 }
  0x1d   : > { %p763_p1 = scmp.lt.s32.totalorder %s983_s15, %s761_s29  ;;  %p764_p2 = scmp.lt.s32.totalorder %s762_s7, %s756_s27 }
  0x1e   : > { %692 = vmatpush3.bf16.msra.mxu1 %v691_v20  ;;  %p759_p0 = pneg %p758_p13 }
  0x1f   : > { %p765_p3 = por %p764_p2, %p763_p1 }
  0x21   : > { %p766_p5 = pnand %p765_p3, %p759_p0 }
  0xee   : > { %v373_v22 = vpop.f32.mrb[0].mxu0 }
  0xef   : > { %v374_v23 = vadd.f32 %v622_v21, %v373_v22  ;;  %v655_v24 = vpop.f32.mrb[1].mxu0 }
  0xf1   : > { %385 = vrot.lane.b32.xlu0 %v374_v23, %s839_s8  ;;  %v624_v25 = vmul.f32 -1.442695, %v374_v23 }
  0xf3   : > { %752 = vpow2.f32 %v624_v25 }
  0xfd   : > { %v753_v26 = vpop.eup %752 }
  0xfe   : > { %v380_v27 = vadd.f32 1.0, %v753_v26 }
 0x100   : > { %754 = vrcp.f32 %v380_v27 }
 0x10a   : > { %v755_v28 = vpop.eup %754 }
 0x10b   : > { %v383_v29 = vmul.f32 %v755_v28, %v374_v23 }
 0x163   : > { %v386_v30 = vpop.permute.xlu0 %385 }
 0x164   : > { %v388_v31 = vmul.f32 %v386_v30, %v383_v29 }
 0x166   : > { %673 = vmatmul.mubr.msk.f32.vlgmr.msra.gmra.mrb[0].mxu1 %vm398_vm2, %v388_v31 }
 0x239   : > { %v468_v33 = vpop.f32.mrb[0].mxu1 }
 0x23a   : > { %v472_v34 = vadd.f32 %v468_v33, %v389_v32  ;;  %v674_v35 = vpop.f32.mrb[1].mxu1 }
 0x23c   : > { %473 = vst.msk [vmem:[#allocation2] sm:$0xff] %vm289_vm1, %v472_v34 }
 0x243   : > { %v477_v37 = vld [vmem:[#allocation2] sm:$0xff] }
 0x244   : > { %v485_v38 = vadd.f32 %v626_v36, %v477_v37 }
 0x246   : > { %486 = vst.msk [vmem:[%s267_s14] sm:$0xff] %vm289_vm1, %v485_v38 }
 0x247   : > { %769 = shalt.err (!%p766_p5)
}
 0x248   : > { %s770_s8 = scalar_lea.hbm %s981_s24, 128  ;;  %s774_s11 = scalar_lea.hbm %s1034_s5, 256 }
 0x249   : > { %p771_p6 = scmp.ne.s32.totalorder %s981_s24, %s770_s8  ;;  %p775_p10 = scmp.lt.u32.totalorder %s981_s24, %s1034_s5 }
 0x24a   : > { %p776_p11 = scmp.lt.u32.totalorder %s774_s11, %s770_s8  ;;  %p778_p13 = scmp.lt.u32.totalorder %s770_s8, %s981_s24 }
 0x24b   : > { %p772_p7 = pnand %p771_p6, %p911_p4 }
 0x24c   : > { %p777_p12 = por %p776_p11, %p775_p10 }
 0x24d   : > { %p773_p9 = pneg %p772_p7 }
 0x24e   : > { %p779_p0 = por %p778_p13, %p777_p12 }
 0x250   : > { %p780_p1 = pnand %p779_p0, %p773_p9 }
 0x252   : > { %783 = shalt.err (!%p780_p1)
}
 0x253   : > { %693 = dma.vmem_to_hbm [thread:$0]  (%p911_p4), %s983_s15, 128, %s981_s24, %s488_s25  }
 0x254 PF: > { %p699_p2 = scmp.ge.s32.totalorder %s834_s23, 2  ;;  %s513_s14 = sand.u32 1, %s814_s18  }
 0x255   : > { %s514_s16 = scalar_lea.sflag [#allocation4], %s513_s14 }
 0x256   : > { %p696_p3 = pnand %p699_p2, %p918_p8 }
 0x258   : > { %809 = dma.done.wait (!%p696_p3), %s514_s16, 128  }
 0x259   : > { %811 = vsyncadd (!%p696_p3), %s514_s16, 4294967168  ;;  %s18_s23 = sadd.s32 1, %s834_s23   ;;  %s1037_s18 = smov %s818_s19 }
 0x25a   : > { %p15_p5 = scmp.ge.s32.totalorder %s18_s23, 4   ;;  %s1038_s19 = smov %s822_s20 }
 0x25b   : > { %s1039_s20 = smov %s924_s6  ;;  %s1040_s21 = smov %s830_s22 }
 0x25c   : > { %s1041_s22 = smov %s1043_s26  ;;  %17 = sbr.rel (!%p15_p5) target bundleno = 4 (0x4), region = 92 }
 0x263   :  { %519 = vsyncpa [#allocation4], 1 }
 0x264   :  { %521 = vsyncpa [#allocation4 + $0x1], 1 }

</bundles_post_ra>
